<compile_context>
chip_gen: v7x
topology: tpu7x:2x2x1
jax: 0.10.0
libtpu: 0.0.40
codegen_flags: <defaults>
</compile_context>

<pallas_src>
import functools

import jax
import jax.numpy as jnp
from jax.experimental import pallas as pl
from jax.experimental.pallas import tpu as pltpu


def _round_up(x, m):
    return ((x + m - 1) // m) * m


def capsule_loss_kernel(w_ref, targets_ref, pred_ref, caps_ref, img_ref,
                        w1_ref, b1_ref, w2_ref, b2_ref, w3_ref, b3_ref,
                        out_ref, acc_ref, *, batch_size, tile_b):
    i = pl.program_id(0)

    @pl.when(i == 0)
    def _init():
        acc_ref[0] = jnp.float32(0.0)   # running BCE sum
        acc_ref[1] = jnp.float32(0.0)   # running MSE sum

    targets = targets_ref[...]          # (TB, C)
    pred = pred_ref[...]                # (TB, C)
    gt_caps = caps_ref[...]             # (TB, D)   gathered in the wrapper
    img = img_ref[...]                  # (TB, OUT) flattened gt images

    TB, C = targets.shape
    OUT = img.shape[1]

    # Rows beyond the true batch size are zero padding -> mask them out.
    row = i * tile_b + jax.lax.broadcasted_iota(jnp.int32, (TB, 1), 0)
    mask = (row < batch_size).astype(jnp.float32)            # (TB, 1)

    # ---- decoder MLP: D -> H1 -> H2 -> OUT (ReLU, ReLU, Sigmoid) --------------
    # NOTE: for MNIST-real decoder sizes, cast gt_caps / weights to bf16 here
    # (MXU-native, f32 accumulate); kept f32 for exact numeric parity at toy sizes.
    h1 = jnp.dot(gt_caps, w1_ref[...], preferred_element_type=jnp.float32) + b1_ref[...]
    h1 = jnp.maximum(h1, 0.0)
    h2 = jnp.dot(h1, w2_ref[...], preferred_element_type=jnp.float32) + b2_ref[...]
    h2 = jnp.maximum(h2, 0.0)
    logits = jnp.dot(h2, w3_ref[...], preferred_element_type=jnp.float32) + b3_ref[...]
    recon = jax.nn.sigmoid(logits)                            # (TB, OUT)

    # ---- masked partial sums ---------------------------------------------------
    diff = recon - img
    mse_part = jnp.sum(diff * diff * mask)

    # nn.BCELoss clamps the log terms at -100 (also neutralizes log(0) on pad rows)
    logp = jnp.maximum(jnp.log(pred), -100.0)
    log1mp = jnp.maximum(jnp.log(1.0 - pred), -100.0)
    bce = -(targets * logp + (1.0 - targets) * log1mp)
    bce_part = jnp.sum(bce * mask)

    acc_ref[0] = acc_ref[0] + bce_part
    acc_ref[1] = acc_ref[1] + mse_part

    @pl.when(i == pl.num_programs(0) - 1)
    def _finalize():
        pred_loss = acc_ref[0] / jnp.float32(batch_size * C)
        recon_loss = acc_ref[1] / jnp.float32(batch_size * OUT)
        out_ref[0, 0] = pred_loss + w_ref[0, 0] * recon_loss


def capsule_reconstruction_loss(prediction, capsules, gt_images, decoder_params,
                                targets, reconstruction_weight, *, tile_b=None):
    """Wrapper: gather gt capsules + flatten images in XLA, run the fused Pallas loss."""
    w1, b1, w2, b2, w3, b3 = decoder_params
    B, C = targets.shape
    D = capsules.shape[-1]

    def _f32(x):
        return x if x.dtype == jnp.float32 else x.astype(jnp.float32)

    targets = _f32(targets)
    prediction = _f32(prediction)

    # gt_capsules = capsules[arange(B), argmax(targets, 1)]  (done in XLA so the
    # kernel gets a lane-dense (B, D) tile; matches torch first-max tie behaviour)
    idx = jnp.argmax(targets, axis=1)
    gt_caps = _f32(jnp.take_along_axis(capsules, idx[:, None, None], axis=1)[:, 0, :])

    img_flat = _f32(gt_images.reshape(B, -1))
    out_dim = img_flat.shape[1]

    # Batch tiling: multiple-of-8 sublane tiles; 128 rows/step once B is large.
    if tile_b is None:
        tile_b = 128 if B >= 128 else _round_up(B, 8)
    b_pad = _round_up(B, tile_b)
    if b_pad != B:
        pad = ((0, b_pad - B), (0, 0))
        targets = jnp.pad(targets, pad)
        prediction = jnp.pad(prediction, pad)
        gt_caps = jnp.pad(gt_caps, pad)
        img_flat = jnp.pad(img_flat, pad)
    n_tiles = b_pad // tile_b

    params = [_f32(p) for p in (w1, b1, w2, b2, w3, b3)]
    H1 = params[0].shape[1]
    H2 = params[2].shape[1]

    w_scalar = jnp.full((1, 1), reconstruction_weight, jnp.float32)

    smem = pl.BlockSpec(memory_space=pltpu.MemorySpace.SMEM)
    full = lambda shape: pl.BlockSpec(shape, lambda i: (0, 0))        # weights: resident
    batched = lambda cols: pl.BlockSpec((tile_b, cols), lambda i: (i, 0))

    kernel = functools.partial(capsule_loss_kernel, batch_size=B, tile_b=tile_b)

    out = pl.pallas_call(
        kernel,
        out_shape=jax.ShapeDtypeStruct((1, 1), jnp.float32),
        grid=(n_tiles,),
        in_specs=[
            smem,                                   # reconstruction weight (SMEM scalar)
            batched(C),                             # targets
            batched(C),                             # prediction
            batched(D),                             # gt capsules
            batched(out_dim),                       # flattened gt images
            full((D, H1)), full((1, H1)),           # decoder layer 1
            full((H1, H2)), full((1, H2)),          # decoder layer 2
            full((H2, out_dim)), full((1, out_dim)),  # decoder layer 3
        ],
        out_specs=smem,
        scratch_shapes=[pltpu.SMEM((2,), jnp.float32)],
        compiler_params=pltpu.CompilerParams(
            dimension_semantics=("arbitrary",)),    # scalar reduction over batch tiles
    )(w_scalar, targets, prediction, gt_caps, img_flat, *params)
    return out[0, 0]


def reference_loss(prediction, capsules, gt_images, decoder_params, targets, w):
    """Pure-JAX reference mirroring the PyTorch module."""
    w1, b1, w2, b2, w3, b3 = decoder_params
    B = targets.shape[0]
    idx = jnp.argmax(targets, axis=1)
    gt_caps = capsules[jnp.arange(B), idx]
    h1 = jax.nn.relu(gt_caps @ w1 + b1)
    h2 = jax.nn.relu(h1 @ w2 + b2)
    recon = jax.nn.sigmoid(h2 @ w3 + b3)
    img = gt_images.reshape(B, -1)
    mse = jnp.mean((recon - img) ** 2)
    bce = jnp.mean(-(targets * jnp.log(prediction)
                     + (1.0 - targets) * jnp.log(1.0 - prediction)))
    return bce + w * mse


if __name__ == "__main__":
    # Small CapsNet-ish shapes
    B, C, D = 8, 10, 16          # batch, num classes, capsule dim
    H1, H2 = 128, 128            # decoder hidden sizes
    IMG_H = IMG_W = 16
    OUT = IMG_H * IMG_W          # decoder output / flattened image size
    RECON_WEIGHT = 0.0005

    key = jax.random.PRNGKey(0)
    ks = jax.random.split(key, 10)

    # predictions in (0,1), one-hot targets, capsules, images in [0,1]
    prediction = jax.nn.sigmoid(jax.random.normal(ks[0], (B, C), jnp.float32))
    labels = jax.random.randint(ks[1], (B,), 0, C)
    targets = jax.nn.one_hot(labels, C, dtype=jnp.float32)
    capsules = jax.random.normal(ks[2], (B, C, D), jnp.float32) * 0.5
    gt_images = jax.nn.sigmoid(jax.random.normal(ks[3], (B, 1, IMG_H, IMG_W), jnp.float32))

    # Deterministic decoder parameters (synthetic "decoder" module: 3-layer MLP)
    w1 = jax.random.normal(ks[4], (D, H1), jnp.float32) * 0.1
    b1 = jnp.zeros((1, H1), jnp.float32)
    w2 = jax.random.normal(ks[5], (H1, H2), jnp.float32) * 0.1
    b2 = jnp.zeros((1, H2), jnp.float32)
    w3 = jax.random.normal(ks[6], (H2, OUT), jnp.float32) * 0.1
    b3 = jnp.zeros((1, OUT), jnp.float32)
    decoder_params = (w1, b1, w2, b2, w3, b3)

    loss = capsule_reconstruction_loss(prediction, capsules, gt_images,
                                       decoder_params, targets, RECON_WEIGHT)
    loss = jax.block_until_ready(loss)

    ref = reference_loss(prediction, capsules, gt_images, decoder_params,
                         targets, RECON_WEIGHT)
    assert jnp.allclose(loss, ref, rtol=1e-4, atol=1e-5), (loss, ref)

    print("KERNEL_OK")
</pallas_src>

<mosaic_0001>
module attributes {stable_mosaic.version = 11 : i64} {
  func.func @capsule_loss_kernel(%arg0: i32, %arg1: memref<1x1xf32, #tpu.memory_space<smem>>, %arg2: memref<8x10xf32, #tpu.memory_space<vmem>>, %arg3: memref<8x10xf32, #tpu.memory_space<vmem>>, %arg4: memref<8x16xf32, #tpu.memory_space<vmem>>, %arg5: memref<8x256xf32, #tpu.memory_space<vmem>>, %arg6: memref<16x128xf32, #tpu.memory_space<vmem>>, %arg7: memref<1x128xf32, #tpu.memory_space<vmem>>, %arg8: memref<128x128xf32, #tpu.memory_space<vmem>>, %arg9: memref<1x128xf32, #tpu.memory_space<vmem>>, %arg10: memref<128x256xf32, #tpu.memory_space<vmem>>, %arg11: memref<1x256xf32, #tpu.memory_space<vmem>>, %arg12: memref<1x1xf32, #tpu.memory_space<smem>>, %arg13: memref<2xf32, #tpu.memory_space<smem>>) attributes {dimension_semantics = [#tpu.dimension_semantics<arbitrary>], iteration_bounds = array<i64: 1>, scalar_prefetch = 0 : i64, scratch_operands = 1 : i64, tpu.core_type = #tpu.core_type<tc>, window_params = [{transform_indices = @transform_0, window_bounds = array<i64: 1, 1>}, {transform_indices = @transform_1, window_bounds = array<i64: 8, 10>}, {transform_indices = @transform_2, window_bounds = array<i64: 8, 10>}, {transform_indices = @transform_3, window_bounds = array<i64: 8, 16>}, {transform_indices = @transform_4, window_bounds = array<i64: 8, 256>}, {pipeline_mode = #tpu.pipeline_mode<synchronous>, transform_indices = @transform_5, window_bounds = array<i64: 16, 128>}, {pipeline_mode = #tpu.pipeline_mode<synchronous>, transform_indices = @transform_6, window_bounds = array<i64: 1, 128>}, {pipeline_mode = #tpu.pipeline_mode<synchronous>, transform_indices = @transform_7, window_bounds = array<i64: 128, 128>}, {pipeline_mode = #tpu.pipeline_mode<synchronous>, transform_indices = @transform_8, window_bounds = array<i64: 1, 128>}, {pipeline_mode = #tpu.pipeline_mode<synchronous>, transform_indices = @transform_9, window_bounds = array<i64: 128, 256>}, {pipeline_mode = #tpu.pipeline_mode<synchronous>, transform_indices = @transform_10, window_bounds = array<i64: 1, 256>}, {transform_indices = @transform_11, window_bounds = array<i64: 1, 1>}]} {
    %c0_i32 = arith.constant 0 : i32
    %0 = arith.cmpi eq, %arg0, %c0_i32 : i32
    %1 = arith.extui %0 : i1 to i32
    %c0_i32_0 = arith.constant 0 : i32
    %2 = arith.cmpi ne, %1, %c0_i32_0 : i32
    scf.if %2 {
      %cst_38 = arith.constant 0.000000e+00 : f32
      %c0_39 = arith.constant 0 : index
      %77 = memref.load %arg13[%c0_39] : memref<2xf32, #tpu.memory_space<smem>>
      memref.store %cst_38, %arg13[%c0_39] : memref<2xf32, #tpu.memory_space<smem>>
      %cst_40 = arith.constant 0.000000e+00 : f32
      %c1_41 = arith.constant 1 : index
      %78 = memref.load %arg13[%c1_41] : memref<2xf32, #tpu.memory_space<smem>>
      memref.store %cst_40, %arg13[%c1_41] : memref<2xf32, #tpu.memory_space<smem>>
    } else {
    }
    %c0 = arith.constant 0 : index
    %c0_1 = arith.constant 0 : index
    %3 = vector.load %arg2[%c0, %c0_1] : memref<8x10xf32, #tpu.memory_space<vmem>>, vector<8x10xf32>
    %c0_2 = arith.constant 0 : index
    %c0_3 = arith.constant 0 : index
    %4 = vector.load %arg3[%c0_2, %c0_3] : memref<8x10xf32, #tpu.memory_space<vmem>>, vector<8x10xf32>
    %c0_4 = arith.constant 0 : index
    %c0_5 = arith.constant 0 : index
    %5 = vector.load %arg4[%c0_4, %c0_5] : memref<8x16xf32, #tpu.memory_space<vmem>>, vector<8x16xf32>
    %c0_6 = arith.constant 0 : index
    %c0_7 = arith.constant 0 : index
    %6 = vector.load %arg5[%c0_6, %c0_7] : memref<8x256xf32, #tpu.memory_space<vmem>>, vector<8x256xf32>
    %c8_i32 = arith.constant 8 : i32
    %7 = arith.muli %arg0, %c8_i32 : i32
    %8 = tpu.iota {dimensions = array<i32: 0>} : vector<8x1xi32>
    %9 = vector.broadcast %7 : i32 to vector<8x1xi32>
    %10 = arith.addi %9, %8 : vector<8x1xi32>
    %c8_i32_8 = arith.constant 8 : i32
    %11 = vector.broadcast %c8_i32_8 : i32 to vector<8x1xi32>
    %12 = arith.cmpi slt, %10, %11 : vector<8x1xi32>
    %13 = arith.extui %12 : vector<8x1xi1> to vector<8x1xi32>
    %14 = arith.sitofp %13 : vector<8x1xi32> to vector<8x1xf32>
    %c0_9 = arith.constant 0 : index
    %c0_10 = arith.constant 0 : index
    %15 = vector.load %arg6[%c0_9, %c0_10] : memref<16x128xf32, #tpu.memory_space<vmem>>, vector<16x128xf32>
    %cst = arith.constant dense<0.000000e+00> : vector<8x128xf32>
    %16 = tpu.matmul %5, %15, %cst {dimension_numbers = #tpu.dot_dimension_numbers<[1], [0], [0], [1], [0, 0, 1, 1], [], []>} : vector<8x16xf32>, vector<16x128xf32>, vector<8x128xf32> -> vector<8x128xf32>
    %c0_11 = arith.constant 0 : index
    %c0_12 = arith.constant 0 : index
    %17 = vector.load %arg7[%c0_11, %c0_12] : memref<1x128xf32, #tpu.memory_space<vmem>>, vector<1x128xf32>
    %18 = vector.broadcast %17 : vector<1x128xf32> to vector<8x128xf32>
    %19 = arith.addf %16, %18 : vector<8x128xf32>
    %cst_13 = arith.constant 0.000000e+00 : f32
    %20 = vector.broadcast %cst_13 : f32 to vector<8x128xf32>
    %21 = arith.maximumf %19, %20 : vector<8x128xf32>
    %c0_14 = arith.constant 0 : index
    %c0_15 = arith.constant 0 : index
    %22 = vector.load %arg8[%c0_14, %c0_15] : memref<128x128xf32, #tpu.memory_space<vmem>>, vector<128x128xf32>
    %cst_16 = arith.constant dense<0.000000e+00> : vector<8x128xf32>
    %23 = tpu.matmul %21, %22, %cst_16 {dimension_numbers = #tpu.dot_dimension_numbers<[1], [0], [0], [1], [0, 0, 1, 1], [], []>} : vector<8x128xf32>, vector<128x128xf32>, vector<8x128xf32> -> vector<8x128xf32>
    %c0_17 = arith.constant 0 : index
    %c0_18 = arith.constant 0 : index
    %24 = vector.load %arg9[%c0_17, %c0_18] : memref<1x128xf32, #tpu.memory_space<vmem>>, vector<1x128xf32>
    %25 = vector.broadcast %24 : vector<1x128xf32> to vector<8x128xf32>
    %26 = arith.addf %23, %25 : vector<8x128xf32>
    %cst_19 = arith.constant 0.000000e+00 : f32
    %27 = vector.broadcast %cst_19 : f32 to vector<8x128xf32>
    %28 = arith.maximumf %26, %27 : vector<8x128xf32>
    %c0_20 = arith.constant 0 : index
    %c0_21 = arith.constant 0 : index
    %29 = vector.load %arg10[%c0_20, %c0_21] : memref<128x256xf32, #tpu.memory_space<vmem>>, vector<128x256xf32>
    %cst_22 = arith.constant dense<0.000000e+00> : vector<8x256xf32>
    %30 = tpu.matmul %28, %29, %cst_22 {dimension_numbers = #tpu.dot_dimension_numbers<[1], [0], [0], [1], [0, 0, 1, 1], [], []>} : vector<8x128xf32>, vector<128x256xf32>, vector<8x256xf32> -> vector<8x256xf32>
    %c0_23 = arith.constant 0 : index
    %c0_24 = arith.constant 0 : index
    %31 = vector.load %arg11[%c0_23, %c0_24] : memref<1x256xf32, #tpu.memory_space<vmem>>, vector<1x256xf32>
    %32 = vector.broadcast %31 : vector<1x256xf32> to vector<8x256xf32>
    %33 = arith.addf %30, %32 : vector<8x256xf32>
    %34 = arith.negf %33 : vector<8x256xf32>
    %35 = math.exp %34 : vector<8x256xf32>
    %cst_25 = arith.constant 1.000000e+00 : f32
    %36 = vector.broadcast %cst_25 : f32 to vector<8x256xf32>
    %37 = arith.addf %36, %35 : vector<8x256xf32>
    %38 = arith.divf %36, %37 : vector<8x256xf32>
    %39 = arith.subf %38, %6 : vector<8x256xf32>
    %40 = arith.mulf %39, %39 : vector<8x256xf32>
    %41 = vector.broadcast %14 : vector<8x1xf32> to vector<8x256xf32>
    %42 = arith.mulf %40, %41 : vector<8x256xf32>
    %43 = vector.shape_cast %42 : vector<8x256xf32> to vector<1x8x256xf32>
    %cst_26 = arith.constant dense<0.000000e+00> : vector<1xf32>
    %44 = vector.multi_reduction <add>, %43, %cst_26 [1, 2] : vector<1x8x256xf32> to vector<1xf32>
    %45 = vector.shape_cast %44 : vector<1xf32> to vector<1x1x1xf32>
    %46 = vector.extract %45[0, 0, 0] : f32 from vector<1x1x1xf32>
    %47 = math.log %4 : vector<8x10xf32>
    %cst_27 = arith.constant -1.000000e+02 : f32
    %48 = vector.broadcast %cst_27 : f32 to vector<8x10xf32>
    %49 = arith.maximumf %47, %48 : vector<8x10xf32>
    %cst_28 = arith.constant 1.000000e+00 : f32
    %50 = vector.broadcast %cst_28 : f32 to vector<8x10xf32>
    %51 = arith.subf %50, %4 : vector<8x10xf32>
    %52 = math.log %51 : vector<8x10xf32>
    %cst_29 = arith.constant -1.000000e+02 : f32
    %53 = vector.broadcast %cst_29 : f32 to vector<8x10xf32>
    %54 = arith.maximumf %52, %53 : vector<8x10xf32>
    %55 = arith.mulf %3, %49 : vector<8x10xf32>
    %cst_30 = arith.constant 1.000000e+00 : f32
    %56 = vector.broadcast %cst_30 : f32 to vector<8x10xf32>
    %57 = arith.subf %56, %3 : vector<8x10xf32>
    %58 = arith.mulf %57, %54 : vector<8x10xf32>
    %59 = arith.addf %55, %58 : vector<8x10xf32>
    %cst_31 = arith.constant 0.000000e+00 : f32
    %60 = vector.broadcast %cst_31 : f32 to vector<8x10xf32>
    %61 = arith.subf %60, %59 : vector<8x10xf32>
    %62 = vector.broadcast %14 : vector<8x1xf32> to vector<8x10xf32>
    %63 = arith.mulf %61, %62 : vector<8x10xf32>
    %64 = vector.shape_cast %63 : vector<8x10xf32> to vector<1x8x10xf32>
    %cst_32 = arith.constant dense<0.000000e+00> : vector<1xf32>
    %65 = vector.multi_reduction <add>, %64, %cst_32 [1, 2] : vector<1x8x10xf32> to vector<1xf32>
    %66 = vector.shape_cast %65 : vector<1xf32> to vector<1x1x1xf32>
    %67 = vector.extract %66[0, 0, 0] : f32 from vector<1x1x1xf32>
    %c0_33 = arith.constant 0 : index
    %68 = memref.load %arg13[%c0_33] : memref<2xf32, #tpu.memory_space<smem>>
    %69 = arith.addf %68, %67 : f32
    %c0_34 = arith.constant 0 : index
    %70 = memref.load %arg13[%c0_34] : memref<2xf32, #tpu.memory_space<smem>>
    memref.store %69, %arg13[%c0_34] : memref<2xf32, #tpu.memory_space<smem>>
    %c1 = arith.constant 1 : index
    %71 = memref.load %arg13[%c1] : memref<2xf32, #tpu.memory_space<smem>>
    %72 = arith.addf %71, %46 : f32
    %c1_35 = arith.constant 1 : index
    %73 = memref.load %arg13[%c1_35] : memref<2xf32, #tpu.memory_space<smem>>
    memref.store %72, %arg13[%c1_35] : memref<2xf32, #tpu.memory_space<smem>>
    %c0_i32_36 = arith.constant 0 : i32
    %74 = arith.cmpi eq, %arg0, %c0_i32_36 : i32
    %75 = arith.extui %74 : i1 to i32
    %c0_i32_37 = arith.constant 0 : i32
    %76 = arith.cmpi ne, %75, %c0_i32_37 : i32
    scf.if %76 {
      %c0_38 = arith.constant 0 : index
      %77 = memref.load %arg13[%c0_38] : memref<2xf32, #tpu.memory_space<smem>>
      %cst_39 = arith.constant 8.000000e+01 : f32
      %78 = arith.divf %77, %cst_39 : f32
      %c1_40 = arith.constant 1 : index
      %79 = memref.load %arg13[%c1_40] : memref<2xf32, #tpu.memory_space<smem>>
      %cst_41 = arith.constant 2.048000e+03 : f32
      %80 = arith.divf %79, %cst_41 : f32
      %c0_42 = arith.constant 0 : index
      %c0_43 = arith.constant 0 : index
      %81 = memref.load %arg1[%c0_42, %c0_43] : memref<1x1xf32, #tpu.memory_space<smem>>
      %82 = arith.mulf %81, %80 : f32
      %83 = arith.addf %78, %82 : f32
      %c0_44 = arith.constant 0 : index
      %c0_45 = arith.constant 0 : index
      %84 = memref.load %arg12[%c0_44, %c0_45] : memref<1x1xf32, #tpu.memory_space<smem>>
      memref.store %83, %arg12[%c0_44, %c0_45] : memref<1x1xf32, #tpu.memory_space<smem>>
    } else {
    }
    return
  }
  func.func @transform_0(%arg0: i32) -> (i32, i32) {
    %c0_i32 = arith.constant 0 : i32
    %c0_i32_0 = arith.constant 0 : i32
    %c0_i32_1 = arith.constant 0 : i32
    return %c0_i32, %c0_i32_0 : i32, i32
  }
  func.func @transform_1(%arg0: i32) -> (i32, i32) {
    %c0_i32 = arith.constant 0 : i32
    %c0_i32_0 = arith.constant 0 : i32
    return %arg0, %c0_i32 : i32, i32
  }
  func.func @transform_2(%arg0: i32) -> (i32, i32) {
    %c0_i32 = arith.constant 0 : i32
    %c0_i32_0 = arith.constant 0 : i32
    return %arg0, %c0_i32 : i32, i32
  }
  func.func @transform_3(%arg0: i32) -> (i32, i32) {
    %c0_i32 = arith.constant 0 : i32
    %c0_i32_0 = arith.constant 0 : i32
    return %arg0, %c0_i32 : i32, i32
  }
  func.func @transform_4(%arg0: i32) -> (i32, i32) {
    %c0_i32 = arith.constant 0 : i32
    %c0_i32_0 = arith.constant 0 : i32
    return %arg0, %c0_i32 : i32, i32
  }
  func.func @transform_5(%arg0: i32) -> (i32, i32) {
    %c0_i32 = arith.constant 0 : i32
    %c0_i32_0 = arith.constant 0 : i32
    %c0_i32_1 = arith.constant 0 : i32
    return %c0_i32, %c0_i32_0 : i32, i32
  }
  func.func @transform_6(%arg0: i32) -> (i32, i32) {
    %c0_i32 = arith.constant 0 : i32
    %c0_i32_0 = arith.constant 0 : i32
    %c0_i32_1 = arith.constant 0 : i32
    return %c0_i32, %c0_i32_0 : i32, i32
  }
  func.func @transform_7(%arg0: i32) -> (i32, i32) {
    %c0_i32 = arith.constant 0 : i32
    %c0_i32_0 = arith.constant 0 : i32
    %c0_i32_1 = arith.constant 0 : i32
    return %c0_i32, %c0_i32_0 : i32, i32
  }
  func.func @transform_8(%arg0: i32) -> (i32, i32) {
    %c0_i32 = arith.constant 0 : i32
    %c0_i32_0 = arith.constant 0 : i32
    %c0_i32_1 = arith.constant 0 : i32
    return %c0_i32, %c0_i32_0 : i32, i32
  }
  func.func @transform_9(%arg0: i32) -> (i32, i32) {
    %c0_i32 = arith.constant 0 : i32
    %c0_i32_0 = arith.constant 0 : i32
    %c0_i32_1 = arith.constant 0 : i32
    return %c0_i32, %c0_i32_0 : i32, i32
  }
  func.func @transform_10(%arg0: i32) -> (i32, i32) {
    %c0_i32 = arith.constant 0 : i32
    %c0_i32_0 = arith.constant 0 : i32
    %c0_i32_1 = arith.constant 0 : i32
    return %c0_i32, %c0_i32_0 : i32, i32
  }
  func.func @transform_11(%arg0: i32) -> (i32, i32) {
    %c0_i32 = arith.constant 0 : i32
    %c0_i32_0 = arith.constant 0 : i32
    %c0_i32_1 = arith.constant 0 : i32
    return %c0_i32, %c0_i32_0 : i32, i32
  }
}

</mosaic_0001>

<bundles_post_ra>
// kernel: tpu_custom_call.1
= control target key start
LH: loop header
LB: loop body
LE: loop exit
PB: predicated region body
PF: predicated region fallthrough
CT: control target
= control target key end

     0   :  { %17 = vsyncpa [#allocation5], 0  ;;  %s1007_s0 = inlined_call_operand.<no memory space> [shape: f32[1,1], index: 0, kind: input, shape index: {}]   ;;  %s1008_s1 = inlined_call_operand.hbm [shape: f32[8,10], index: 1, kind: input, shape index: {}]   ;;  %s1009_s2 = inlined_call_operand.hbm [shape: f32[8,10], index: 2, kind: input, shape index: {}]   ;;  %s1010_s3 = inlined_call_operand.hbm [shape: f32[8,16], index: 3, kind: input, shape index: {}]   ;;  %s1011_s4 = inlined_call_operand.hbm [shape: f32[8,256], index: 4, kind: input, shape index: {}]   ;;  %s1012_s5 = inlined_call_operand.vmem [shape: f32[16,128], index: 5, kind: input, shape index: {}]   ;;  %s1013_s6 = inlined_call_operand.vmem [shape: f32[1,128], index: 6, kind: input, shape index: {}]   ;;  %s1014_s7 = inlined_call_operand.hbm [shape: f32[128,128], index: 7, kind: input, shape index: {}]   ;;  %s1015_s8 = inlined_call_operand.vmem [shape: f32[1,128], index: 8, kind: input, shape index: {}]   ;;  %s1016_s9 = inlined_call_operand.hbm [shape: f32[128,256], index: 9, kind: input, shape index: {}]   ;;  %s1017_s10 = inlined_call_operand.vmem [shape: f32[1,256], index: 10, kind: input, shape index: {}]   ;;  %s1018_s11 = inlined_call_operand.hbm [shape: f32[1,1], index: 11, kind: output, shape index: {}]  }
   0x1   :  { %18 = vsyncpa [#allocation8], 0 }
   0x2   :  { %19 = vsyncpa [#allocation11], 0 }
   0x3   :  { %20 = vsyncpa [#allocation14], 0 }
   0x4   :  { %21 = vsyncpa [#allocation6], 0  ;;  %s831_s17 = smov [#allocation7]   ;;  %s832_s19 = smov [#allocation10]  }
   0x5   :  { %s40_s18 = sshll.u32 %s831_s17, 4  ;;  %s60_s20 = sshll.u32 %s832_s19, 4  ;;  %s41_s18 = int_to_ptr.vmem [resolvable:$true] %s40_s18  ;;  %s61_s20 = int_to_ptr.vmem [resolvable:$true] %s60_s20 }
   0x6   :  { %s679_s23 = scalar_lea.hbm %s1009_s2, 128 }
   0x7   :  { %p680_p0 = scmp.ne.s32.totalorder %s1009_s2, %s679_s23  ;;  %p683_p1 = scmp.lt.u32.totalorder %s679_s23, %s1009_s2 }
   0x9   :  { %p685_p2 = pnand %p683_p1, %p680_p0 }
   0xb   :  { %688 = shalt.err (!%p685_p2)
}
   0xc   :  { %s689_s28 = scalar_lea.vmem %s41_s18, 128  ;;  %p694_p4 = scmp.lt.s32.totalorder %s41_s18, %s41_s18 }
   0xd   :  { %p690_p3 = scmp.ne.s32.totalorder %s41_s18, %s689_s28  ;;  %p695_p5 = scmp.lt.s32.totalorder %s689_s28, %s689_s28 }
   0xf   :  { %p696_p6 = por %p695_p5, %p694_p4 }
  0x11   :  { %p697_p7 = pnand %p696_p6, %p690_p3 }
  0x13   :  { %700 = shalt.err (!%p697_p7)
}
  0x14   :  { %43 = dma.hbm_to_vmem [thread:$0]  %s1009_s2, 128, %s41_s18, [#allocation8]  }
  0x15   :  { %s701_s14 = scalar_lea.hbm %s1011_s4, 256 }
  0x16   :  { %p702_p8 = scmp.ne.s32.totalorder %s1011_s4, %s701_s14  ;;  %p705_p9 = scmp.lt.u32.totalorder %s701_s14, %s1011_s4 }
  0x18   :  { %p707_p10 = pnand %p705_p9, %p702_p8 }
  0x1a   :  { %710 = shalt.err (!%p707_p10)
}
  0x1b   :  { %s711_s21 = scalar_lea.vmem %s61_s20, 256  ;;  %p716_p12 = scmp.lt.s32.totalorder %s61_s20, %s61_s20 }
  0x1c   :  { %p712_p11 = scmp.ne.s32.totalorder %s61_s20, %s711_s21  ;;  %p717_p13 = scmp.lt.s32.totalorder %s711_s21, %s711_s21 }
  0x1e   :  { %p718_p0 = por %p717_p13, %p716_p12 }
  0x20   :  { %p719_p1 = pnand %p718_p0, %p712_p11 }
  0x22   :  { %722 = shalt.err (!%p719_p1)
}
  0x23   :  { %63 = dma.hbm_to_vmem [thread:$0]  %s1011_s4, 256, %s61_s20, [#allocation11]  }
  0x24   :  { %s833_s22 = smov [#allocation4]   ;;  %s834_s24 = smov [#allocation9]  }
  0x25   :  { %s30_s23 = sshll.u32 %s833_s22, 4  ;;  %s50_s25 = sshll.u32 %s834_s24, 4  ;;  %s31_s23 = int_to_ptr.vmem [resolvable:$true] %s30_s23  ;;  %s51_s25 = int_to_ptr.vmem [resolvable:$true] %s50_s25 }
  0x26   :  { %s723_s28 = scalar_lea.hbm %s1008_s1, 128 }
  0x27   :  { %p724_p2 = scmp.ne.s32.totalorder %s1008_s1, %s723_s28  ;;  %p727_p3 = scmp.lt.u32.totalorder %s723_s28, %s1008_s1 }
  0x29   :  { %p729_p4 = pnand %p727_p3, %p724_p2 }
  0x2b   :  { %732 = shalt.err (!%p729_p4)
}
  0x2c   :  { %s733_s4 = scalar_lea.vmem %s31_s23, 128  ;;  %p738_p6 = scmp.lt.s32.totalorder %s31_s23, %s31_s23 }
  0x2d   :  { %p734_p5 = scmp.ne.s32.totalorder %s31_s23, %s733_s4  ;;  %p739_p7 = scmp.lt.s32.totalorder %s733_s4, %s733_s4 }
  0x2f   :  { %p740_p8 = por %p739_p7, %p738_p6 }
  0x31   :  { %p741_p9 = pnand %p740_p8, %p734_p5 }
  0x33   :  { %744 = shalt.err (!%p741_p9)
}
  0x34   :  { %33 = dma.hbm_to_vmem [thread:$0]  %s1008_s1, 128, %s31_s23, [#allocation5]  }
  0x35   :  { %s745_s17 = scalar_lea.hbm %s1010_s3, 128 }
  0x36   :  { %p746_p10 = scmp.ne.s32.totalorder %s1010_s3, %s745_s17  ;;  %p749_p11 = scmp.lt.u32.totalorder %s745_s17, %s1010_s3 }
  0x38   :  { %p751_p12 = pnand %p749_p11, %p746_p10 }
  0x3a   :  { %754 = shalt.err (!%p751_p12)
}
  0x3b   :  { %s755_s22 = scalar_lea.vmem %s51_s25, 128  ;;  %p760_p0 = scmp.lt.s32.totalorder %s51_s25, %s51_s25 }
  0x3c   :  { %p756_p13 = scmp.ne.s32.totalorder %s51_s25, %s755_s22  ;;  %p761_p1 = scmp.lt.s32.totalorder %s755_s22, %s755_s22 }
  0x3e   :  { %p762_p2 = por %p761_p1, %p760_p0 }
  0x40   :  { %p763_p3 = pnand %p762_p2, %p756_p13 }
  0x42   :  { %766 = shalt.err (!%p763_p3)
}
  0x43   :  { %53 = dma.hbm_to_vmem [thread:$0]  %s1010_s3, 128, %s51_s25, [#allocation8]  }
  0x44   :  { %s835_s24 = smov [#allocation12]   ;;  %s767_s29 = scalar_lea.hbm %s1014_s7, 2048 }
  0x45   :  { %s73_s26 = sshll.u32 %s835_s24, 4  ;;  %p768_p4 = scmp.ne.s32.totalorder %s1014_s7, %s767_s29  ;;  %s74_s26 = int_to_ptr.vmem [resolvable:$true] %s73_s26 }
  0x46   :  { %p771_p5 = scmp.lt.u32.totalorder %s767_s29, %s1014_s7 }
  0x48   :  { %p773_p6 = pnand %p771_p5, %p768_p4 }
  0x4a   :  { %776 = shalt.err (!%p773_p6)
}
  0x4b   :  { %s777_s20 = scalar_lea.vmem %s74_s26, 2048  ;;  %p782_p8 = scmp.lt.s32.totalorder %s74_s26, %s74_s26 }
  0x4c   :  { %p778_p7 = scmp.ne.s32.totalorder %s74_s26, %s777_s20  ;;  %p783_p9 = scmp.lt.s32.totalorder %s777_s20, %s777_s20 }
  0x4e   :  { %p784_p10 = por %p783_p9, %p782_p8 }
  0x50   :  { %p785_p11 = pnand %p784_p10, %p778_p7 }
  0x52   :  { %788 = shalt.err (!%p785_p11)
}
  0x53   :  { %s836_s3 = smov 128   ;;  %s837_s25 = smov 8  }
  0x54   :  { %79 = dma.hbm_to_vmem [thread:$0]  %s1014_s7, 2048, %s74_s26, [#allocation11], %s836_s3, %s836_s3, %s837_s25  }
  0x55   :  { %s838_s16 = smov [#allocation13]   ;;  %s789_s2 = scalar_lea.hbm %s1016_s9, 4096 }
  0x56   :  { %s87_s17 = sshll.u32 %s838_s16, 4  ;;  %p790_p12 = scmp.ne.s32.totalorder %s1016_s9, %s789_s2  ;;  %s88_s17 = int_to_ptr.vmem [resolvable:$true] %s87_s17 }
  0x57   :  { %p793_p13 = scmp.lt.u32.totalorder %s789_s2, %s1016_s9 }
  0x59   :  { %p795_p0 = pnand %p793_p13, %p790_p12 }
  0x5b   :  { %798 = shalt.err (!%p795_p0)
}
  0x5c   :  { %s799_s24 = scalar_lea.vmem %s88_s17, 4096  ;;  %p804_p2 = scmp.lt.s32.totalorder %s88_s17, %s88_s17 }
  0x5d   :  { %p800_p1 = scmp.ne.s32.totalorder %s88_s17, %s799_s24  ;;  %p805_p3 = scmp.lt.s32.totalorder %s799_s24, %s799_s24 }
  0x5f   :  { %p806_p4 = por %p805_p3, %p804_p2 }
  0x61   :  { %p807_p5 = pnand %p806_p4, %p800_p1 }
  0x63   :  { %810 = shalt.err (!%p807_p5)
}
  0x64   :  { %s839_s7 = smov 256   ;;  %s840_s26 = smov 16  }
  0x65   :  { %93 = dma.hbm_to_vmem [thread:$0]  %s1016_s9, 4096, %s88_s17, [#allocation14], %s839_s7, %s839_s7, %s840_s26  }
  0x66   :  { %821 = dma.done.wait [#allocation5], 128  }
  0x67   :  { %822 = vsyncadd [#allocation5], 4294967168 }
  0x68   :  { %823 = dma.done.wait [#allocation8], 256  }
  0x69   :  { %824 = vsyncadd [#allocation8], 4294967040 }
  0x6a   :  { %825 = dma.done.wait [#allocation11], 2304  }
  0x6b   :  { %826 = vsyncadd [#allocation11], 4294964992 }
  0x6c   :  { %827 = dma.done.wait [#allocation14], 4096  }
  0x6d   :  { %828 = vsyncadd [#allocation14], 4294963200  ;;  %v841_v0 = vmov 0.0|0.0   ;;  %vm842_vm0 = vmmov 0   ;;  %v843_v1 = vmov 0.0   ;;  %v135_v2 = vld [vmem:[%s1012_s5] sm:$0xff] }
  0x6e   :  { %590 = vmatprep.subr.bf16.mxu0 %v841_v0  ;;  %552 = vmatprep.mubr.msk.f32.mxu0 %vm842_vm0, %v843_v1  ;;  %v136_v3 = vld [vmem:[%s1012_s5 + $0x8] sm:$0xff]  ;;  %v220_v6 = vld [vmem:[#allocation12 + $0x8] sm:$0xff]  ;;  %v221_v7 = vld [vmem:[#allocation12 + $0x10] sm:$0xff]  ;;  %vm144_vm1 = vcmask 130048   ;;  %vm469_vm2 = vcmask 80896   ;;  %s811_s18 = scalar_lea.hbm %s1018_s11, 16 }
  0x6f   :  { %593 = vmatprep.subr.bf16.mxu1 %v841_v0  ;;  %587 = vmatprep.mubr.msk.f32.mxu1 %vm842_vm0, %v843_v1  ;;  %v591_v4 = vpack.c.bf16 %v136_v3, %v135_v2  ;;  %v219_v5 = vld [vmem:[#allocation12] sm:$0xff]  ;;  %v222_v9 = vld [vmem:[#allocation12 + $0x18] sm:$0xff]  ;;  %v124_v10 = vld [vmem:[#allocation9] sm:$0xff]  ;;  %p812_p6 = scmp.ne.s32.totalorder %s1018_s11, %s811_s18  ;;  %p815_p7 = scmp.lt.u32.totalorder %s811_s18, %s1018_s11 }
  0x70   :  { %v594_v8 = vpack.c.bf16 %v220_v6, %v219_v5  ;;  %v597_v11 = vpack.c.bf16 %v222_v9, %v221_v7  ;;  %v223_v12 = vld [vmem:[#allocation12 + $0x20] sm:$0xff]  ;;  %v224_v13 = vld [vmem:[#allocation12 + $0x28] sm:$0xff]  ;;  %v225_v15 = vld [vmem:[#allocation12 + $0x30] sm:$0xff] }
  0x71   :  { %592 = vmatpush3.bf16.msra.mxu0 %v591_v4  ;;  %v600_v14 = vpack.c.bf16 %v224_v13, %v223_v12  ;;  %v226_v16 = vld [vmem:[#allocation12 + $0x38] sm:$0xff]  ;;  %v227_v18 = vld [vmem:[#allocation12 + $0x40] sm:$0xff]  ;;  %v228_v19 = vld [vmem:[#allocation12 + $0x48] sm:$0xff]  ;;  %p817_p8 = pnand %p815_p7, %p812_p6 }
  0x72   :  { %595 = vmatpush3.bf16.msra.mxu1 %v594_v8  ;;  %v603_v17 = vpack.c.bf16 %v226_v16, %v225_v15  ;;  %v606_v20 = vpack.c.bf16 %v228_v19, %v227_v18  ;;  %v229_v21 = vld [vmem:[#allocation12 + $0x50] sm:$0xff]  ;;  %v230_v22 = vld [vmem:[#allocation12 + $0x58] sm:$0xff]  ;;  %v231_v24 = vld [vmem:[#allocation12 + $0x60] sm:$0xff] }
  0x73   :  { %596 = vmatprep.subr.bf16.mxu1 %v841_v0  ;;  %v609_v23 = vpack.c.bf16 %v230_v22, %v229_v21  ;;  %v232_v25 = vld [vmem:[#allocation12 + $0x68] sm:$0xff]  ;;  %v233_v27 = vld [vmem:[#allocation12 + $0x70] sm:$0xff]  ;;  %v234_v28 = vld [vmem:[#allocation12 + $0x78] sm:$0xff] }
  0x74   :  { %553 = vmatmul.mubr.msk.f32.vlgmr.msra.gmra.mrb[0].mxu0 %vm144_vm1, %v124_v10  ;;  %v612_v26 = vpack.c.bf16 %v232_v25, %v231_v24  ;;  %v615_v29 = vpack.c.bf16 %v234_v28, %v233_v27  ;;  %v314_v30 = vld [vmem:[#allocation13 + $0x8] sm:$0xff]  ;;  %v316_v31 = vld [vmem:[#allocation13 + $0x18] sm:$0xff]  ;;  %v313_v32 = vld [vmem:[#allocation13] sm:$0xff]  ;;  %v347_v24 = vlaneseq }
  0x75   :  { %421 = vmatprep.mubr.f32.mxu0 %v843_v1  ;;  %v617_v33 = vpack.c.bf16 %v316_v31, %v314_v30  ;;  %v315_v34 = vld [vmem:[#allocation13 + $0x10] sm:$0xff]  ;;  %v318_v35 = vld [vmem:[#allocation13 + $0x28] sm:$0xff]  ;;  %v320_v36 = vld [vmem:[#allocation13 + $0x38] sm:$0xff] }
  0x76   :  { %598 = vmatpush3.bf16.msra.mxu1 %v597_v11  ;;  %v619_v37 = vpack.c.bf16 %v315_v34, %v313_v32  ;;  %v621_v38 = vpack.c.bf16 %v320_v36, %v318_v35  ;;  %v317_v39 = vld [vmem:[#allocation13 + $0x20] sm:$0xff]  ;;  %v319_v40 = vld [vmem:[#allocation13 + $0x30] sm:$0xff]  ;;  %v322_v41 = vld [vmem:[#allocation13 + $0x48] sm:$0xff]  ;;  %v348_v25 = vshrl.u32 %v347_v24, 7 }
  0x77   :  { %599 = vmatprep.subr.bf16.mxu1 %v841_v0  ;;  %618 = vmatprep.subr.bf16.mxu0 %v617_v33  ;;  %v324_v42 = vld [vmem:[#allocation13 + $0x58] sm:$0xff]  ;;  %v623_v43 = vpack.c.bf16 %v319_v40, %v317_v39  ;;  %v321_v45 = vld [vmem:[#allocation13 + $0x40] sm:$0xff]  ;;  %v323_v46 = vld [vmem:[#allocation13 + $0x50] sm:$0xff] }
  0x78   :  { %620 = vmatpush1.bf16.msra.mxu0 %v619_v37  ;;  %v625_v44 = vpack.c.bf16 %v324_v42, %v322_v41  ;;  %v326_v47 = vld [vmem:[#allocation13 + $0x68] sm:$0xff]  ;;  %v328_v48 = vld [vmem:[#allocation13 + $0x78] sm:$0xff]  ;;  %v627_v49 = vpack.c.bf16 %v323_v46, %v321_v45  ;;  %v325_v51 = vld [vmem:[#allocation13 + $0x60] sm:$0xff]  ;;  %v353_v28 = vsub.s32 1, %v348_v25 }
  0x79   :  { %622 = vmatprep.subr.bf16.mxu0 %v621_v38  ;;  %v629_v50 = vpack.c.bf16 %v328_v48, %v326_v47  ;;  %v327_v52 = vld [vmem:[#allocation13 + $0x70] sm:$0xff]  ;;  %v330_v53 = vld [vmem:[#allocation13 + $0x88] sm:$0xff]  ;;  %v332_v54 = vld [vmem:[#allocation13 + $0x98] sm:$0xff] }
  0x7a   :  { %601 = vmatpush3.bf16.msra.mxu1 %v600_v14  ;;  %v631_v55 = vpack.c.bf16 %v327_v52, %v325_v51  ;;  %v633_v56 = vpack.c.bf16 %v332_v54, %v330_v53  ;;  %v329_v57 = vld [vmem:[#allocation13 + $0x80] sm:$0xff]  ;;  %v331_v58 = vld [vmem:[#allocation13 + $0x90] sm:$0xff]  ;;  %v334_v59 = vld [vmem:[#allocation13 + $0xa8] sm:$0xff] }
  0x7b   :  { %602 = vmatprep.subr.bf16.mxu1 %v841_v0  ;;  %v336_v60 = vld [vmem:[#allocation13 + $0xb8] sm:$0xff]  ;;  %v635_v61 = vpack.c.bf16 %v331_v58, %v329_v57  ;;  %v333_v63 = vld [vmem:[#allocation13 + $0xa0] sm:$0xff]  ;;  %v338_v1 = vld [vmem:[#allocation13 + $0xc8] sm:$0xff] }
  0x7c   :  { %624 = vmatpush1.bf16.msra.mxu0 %v623_v43  ;;  %v637_v62 = vpack.c.bf16 %v336_v60, %v334_v59  ;;  %v340_v2 = vld [vmem:[#allocation13 + $0xd8] sm:$0xff]  ;;  %v337_v5 = vld [vmem:[#allocation13 + $0xc0] sm:$0xff]  ;;  %v339_v6 = vld [vmem:[#allocation13 + $0xd0] sm:$0xff] }
  0x7d   :  { %626 = vmatprep.subr.bf16.mxu0 %v625_v44  ;;  %v641_v4 = vpack.c.bf16 %v340_v2, %v338_v1  ;;  %v643_v7 = vpack.c.bf16 %v339_v6, %v337_v5  ;;  %v521_v8 = vld [vmem:[%s1013_s6] ss:$0 sm:$0xff]  ;;  %v342_v13 = vld [vmem:[#allocation13 + $0xe8] sm:$0xff]  ;;  %v341_v16 = vld [vmem:[#allocation13 + $0xe0] sm:$0xff] }
  0x7e   :  { %604 = vmatpush3.bf16.msra.mxu1 %v603_v17  ;;  %v344_v14 = vld [vmem:[#allocation13 + $0xf8] sm:$0xff]  ;;  %v343_v17 = vld [vmem:[#allocation13 + $0xf0] sm:$0xff]  ;;  %v123_v30 = vld [vmem:[#allocation7] sm:$0xff] }
  0x7f   :  { %605 = vmatprep.subr.bf16.mxu1 %v841_v0  ;;  %v645_v15 = vpack.c.bf16 %v344_v14, %v342_v13  ;;  %v647_v18 = vpack.c.bf16 %v343_v17, %v341_v16  ;;  %v523_v19 = vld [vmem:[%s1015_s8] ss:$0 sm:$0xff]  ;;  %v459_v33 = vsub.f32 1.0, %v123_v30  ;;  %667 = vlog2.f32 %v123_v30  ;;  %v125_v53 = vld [vmem:[#allocation10] sm:$0xff] }
  0x80   :  { %628 = vmatpush1.bf16.msra.mxu0 %v627_v49  ;;  %v345_v27 = vld [vmem:[%s1017_s10] sm:$0x3] }
  0x81   :  { %630 = vmatprep.subr.bf16.mxu0 %v629_v50  ;;  %v354_v31 = vrot.slane %v345_v27, %v353_v28  ;;  %669 = vlog2.f32 %v459_v33  ;;  %v122_v47 = vld [vmem:[#allocation4] sm:$0xff] }
  0x82   :  { %607 = vmatpush3.bf16.msra.mxu1 %v606_v20  ;;  %v464_v50 = vsub.f32 1.0, %v122_v47  ;;  %v126_v54 = vld [vmem:[#allocation10 + $0x8] sm:$0xff] }
  0x83   :  { %608 = vmatprep.subr.bf16.mxu1 %v841_v0 }
  0x84   :  { %632 = vmatpush1.bf16.msra.mxu0 %v631_v55 }
  0x85   :  { %634 = vmatprep.subr.bf16.mxu0 %v633_v56 }
  0x86   :  { %610 = vmatpush3.bf16.msra.mxu1 %v609_v23 }
  0x87   :  { %611 = vmatprep.subr.bf16.mxu1 %v841_v0 }
  0x88   :  { %636 = vmatpush1.bf16.msra.mxu0 %v635_v61 }
  0x89   :  { %638 = vmatprep.subr.bf16.mxu0 %v637_v62  ;;  %v668_v39 = vpop.eup %667 }
  0x8a   :  { %613 = vmatpush3.bf16.msra.mxu1 %v612_v26  ;;  %v349_v26 = vsub.s32 0, %v348_v25  ;;  %v457_v45 = vmul.f32 0.6931472, %v668_v39 }
  0x8b   :  { %614 = vmatprep.subr.bf16.mxu1 %v841_v0  ;;  %v335_v0 = vld [vmem:[#allocation13 + $0xb0] sm:$0xff]  ;;  %v670_v40 = vpop.eup %669 }
  0x8c   :  { %v639_v3 = vpack.c.bf16 %v335_v0, %v333_v63  ;;  %v461_v46 = vmul.f32 0.6931472, %v670_v40  ;;  %v458_v48 = vmax.f32 %v457_v45, -100.0 }
  0x8e   :  { %616 = vmatpush3.bf16.msra.mxu1 %v615_v29  ;;  %640 = vmatpush1.bf16.msra.mxu0 %v639_v3  ;;  %v350_v29 = vrot.slane %v345_v27, %v349_v26  ;;  %v462_v49 = vmax.f32 %v461_v46, -100.0  ;;  %v463_v51 = vmul.f32 %v458_v48, %v122_v47 }
  0x8f   :  { %642 = vmatprep.subr.bf16.mxu0 %v641_v4 }
  0x90   :  { %v465_v52 = vmul.f32 %v464_v50, %v462_v49 }
  0x92   :  { %644 = vmatpush1.bf16.msra.mxu0 %v643_v7  ;;  %v466_v58 = vadd.f32 %v465_v52, %v463_v51 }
  0x93   :  { %646 = vmatprep.subr.bf16.mxu0 %v645_v15 }
  0x94   :  { %v467_v62 = vsub.f32 0.0, %v466_v58 }
  0x96   :  { %648 = vmatpush1.bf16.msra.mxu0 %v647_v18  ;;  %v470_v0 = vsel %vm469_vm2, %v467_v62, 0.0 }
 0x147   :  { %v214_v9 = vpop.f32.mrb[0].mxu0 }
 0x148   :  { %v215_v10 = vadd.f32 %v521_v8, %v214_v9  ;;  %v554_v11 = vpop.f32.mrb[1].mxu0 }
 0x14a   :  { %v218_v12 = vmax.f32 %v215_v10, 0.0 }
 0x14c   :  { %588 = vmatmul.mubr.f32.vlgmr.msra.gmra.mrb[0].mxu1 %v218_v12 }
 0x21f   :  { %v308_v20 = vpop.f32.mrb[0].mxu1 }
 0x220   :  { %v309_v21 = vadd.f32 %v523_v19, %v308_v20  ;;  %v589_v22 = vpop.f32.mrb[1].mxu1 }
 0x222   :  { %v312_v23 = vmax.f32 %v309_v21, 0.0 }
 0x224   :  { %422 = vmatmul.mubr.f32.vlgmr.msra.gmra.mrb[2].mxu0 %v312_v23 }
 0x2f7   :  { %v423_v32 = vpop.f32.mrb[2].mxu0 }
 0x2f8   :  { %v424_v34 = vadd.f32 %v423_v32, %v350_v29  ;;  %v425_v35 = vpop.f32.mrb[3].mxu0 }
 0x2f9   :  { %v426_v36 = vadd.f32 %v425_v35, %v354_v31 }
 0x2fa   :  { %v524_v37 = vmul.f32 -1.442695, %v424_v34 }
 0x2fb   :  { %v525_v38 = vmul.f32 -1.442695, %v426_v36 }
 0x2fc   :  { %671 = vpow2.f32 %v524_v37 }
 0x2fd   :  { %673 = vpow2.f32 %v525_v38 }
 0x306   :  { %v672_v41 = vpop.eup %671 }
 0x307   :  { %v674_v42 = vpop.eup %673  ;;  %v434_v43 = vadd.f32 1.0, %v672_v41 }
 0x308   :  { %v435_v44 = vadd.f32 1.0, %v674_v42 }
 0x309   :  { %675 = vrcp.f32 %v434_v43 }
 0x30a   :  { %677 = vrcp.f32 %v435_v44 }
 0x313   :  { %v676_v55 = vpop.eup %675 }
 0x314   :  { %v678_v56 = vpop.eup %677  ;;  %v440_v57 = vsub.f32 %v676_v55, %v125_v53 }
 0x315   :  { %v441_v59 = vsub.f32 %v678_v56, %v126_v54 }
 0x316   :  { %v442_v60 = vmul.f32 %v440_v57, %v440_v57 }
 0x317   :  { %v443_v61 = vmul.f32 %v441_v59, %v441_v59 }
 0x319   :  { %v446_v63 = vadd.f32 %v443_v61, %v442_v60 }
 0x31b   :  { %447 = vadd.xlane.f32.xlu0 %v446_v63 }
 0x31f   :  { %471 = vadd.xlane.f32.xlu0 %v470_v0 }
 0x3a8   :  { %v448_v1 = vpop.xlane.xlu0 %447 }
 0x3a9   :  { %v449_v2 = vrot.slane %v448_v1, 4 }
 0x3ab   :  { %v450_v3 = vadd.f32 %v449_v2, %v448_v1 }
 0x3ac   :  { %v472_v4 = vpop.xlane.xlu0 %471 }
 0x3ad   :  { %v451_v5 = vrot.slane %v450_v3, 2  ;;  %v473_v6 = vrot.slane %v472_v4, 4 }
 0x3af   :  { %v474_v7 = vadd.f32 %v473_v6, %v472_v4  ;;  %v452_v8 = vadd.f32 %v451_v5, %v450_v3 }
 0x3b1   :  { %v475_v9 = vrot.slane %v474_v7, 2  ;;  %v453_v10 = vrot.slane %v452_v8, 1 }
 0x3b3   :  { %v476_v11 = vadd.f32 %v475_v9, %v474_v7  ;;  %v454_v12 = vadd.f32 %v453_v10, %v452_v8 }
 0x3b5   :  { %649 = vpush %v454_v12  ;;  %v477_v13 = vrot.slane %v476_v11, 1 }
 0x3b7   :  { %v478_v14 = vadd.f32 %v477_v13, %v476_v11 }
 0x3b9   :  { %651 = vpush %v478_v14 }
 0x3e6   :  { %s650_s8 = spop %649 }
 0x3e7   :  { %s498_s10 = smul.f32 0.00048828125, %s650_s8 }
 0x3e9   :  { %s500_s15 = smul.f32 %s498_s10, %s1007_s0 }
 0x3ea   :  { %s652_s16 = spop %651 }
 0x3eb   :  { %s494_s17 = smul.f32 0.0125, %s652_s16 }
 0x3ed   :  { %s501_s19 = sadd.f32 %s500_s15, %s494_s17 }
 0x3ef   :  { %503 = sst [smem:[#allocation15]] %s501_s19 }
 0x3f0   :  { %820 = shalt.err (!%p817_p8)
}
 0x3f1   :  { %s844_s7 = smov [#allocation15]  }
 0x3f2   :  { %511 = dma.smem_to_hbm %s844_s7, 16, %s1018_s11, [#allocation6]  }
 0x3f3   :  { %829 = dma.done.wait [#allocation6], 16  }
 0x3f4   :  { %830 = vsyncadd [#allocation6], 4294967280 }
 0x3f5   :  { %515 = sfence }
 0x3f6   :  { %516 = vsyncpa [#allocation5], 1 }
 0x3f7   :  { %517 = vsyncpa [#allocation8], 1 }
 0x3f8   :  { %518 = vsyncpa [#allocation11], 1 }
 0x3f9   :  { %519 = vsyncpa [#allocation14], 1 }
 0x3fa   :  { %520 = vsyncpa [#allocation6], 1 }

</bundles_post_ra>
